<compile_context>
chip_gen: v5e
topology: v5e:2x2
jax: 0.10.0
libtpu: 0.0.40
codegen_flags: <defaults>
</compile_context>

<pallas_src>
import functools

import jax
import jax.numpy as jnp
from jax.experimental import pallas as pl
from jax.experimental.pallas import tpu as pltpu

LANE = 128            # padded hidden / classifier width (lane-full vregs)
VEC_ROWS = 8          # small-vector rows in the f32 param slab
MAT_ROWS = 2 * LANE   # W2 (rows 0..127) + Wc1 (rows 128..255) in the matmul-dtype slab


def _round_up(n, m):
    return ((n + m - 1) // m) * m


def _vmem_limit_bytes():
    """Generation-aware VMEM budget: ~75% of physical (96 MiB on v5e/v6e,
    48 MiB on v7x).  Falls back to 48 MiB (safe on every generation)."""
    try:
        cap = int(pltpu.get_tpu_info().vmem_capacity_bytes)
        return max(16 * 1024 * 1024, (cap * 3) // 4)
    except Exception:
        return 48 * 1024 * 1024


# ---------------------------------------------------------------------------
# Pass 1 (grid over row tiles, "parallel"):
#   hw[i] = ReLU((A[i,:] @ x) * w1 + b1) @ W2
# ---------------------------------------------------------------------------
def _layer1_kernel(x_ref, a_ref, pvec_ref, pmat_ref, hw_ref):
    f32 = jnp.float32
    mdt = a_ref.dtype                                   # bf16 fast path / f32 check path
    w1_row = pvec_ref[0:1, :]                           # [1, 128] f32
    b1_row = pvec_ref[1:2, :]
    w2 = pmat_ref[0:LANE, :]                            # [128, 128], already matmul dtype

    ax = jnp.dot(a_ref[...], x_ref[...], preferred_element_type=f32)      # [TM, 1]   MXU
    h = jnp.maximum(ax * w1_row + b1_row, 0.0)                            # [TM, 128] VPU f32
    hw = jnp.dot(h.astype(mdt), w2, preferred_element_type=f32)           # [TM, 128] MXU
    hw_ref[...] = hw.astype(hw_ref.dtype)


# ---------------------------------------------------------------------------
# Pass 2 (grid over row tiles, "parallel"):
#   h2[i] = A[i,:] @ hw + b2 ;  partial_pool[i] = poolT[i,:]^T @ h2[i]
# ---------------------------------------------------------------------------
def _layer2_pool_kernel(a_ref, hw_ref, poolT_ref, pvec_ref, part_ref):
    f32 = jnp.float32
    b2_row = pvec_ref[2:3, :]                                             # [1, 128] f32
    h2 = jnp.dot(a_ref[...], hw_ref[...], preferred_element_type=f32) + b2_row   # [TM, 128]
    # partial pooled sum for this tile's nodes: [G, 128]
    part = jax.lax.dot_general(poolT_ref[...], h2,
                               (((0,), (0,)), ((), ())),
                               preferred_element_type=f32)
    part_ref[...] = part.reshape(part_ref.shape)                          # [1, G, 128]


# ---------------------------------------------------------------------------
# Head (grid-less, tiny): sum partials, classifier MLP, sigmoid.
# ---------------------------------------------------------------------------
def _head_kernel(part_ref, pvec_ref, pmat_ref, out_ref):
    f32 = jnp.float32
    mdt = pmat_ref.dtype
    bc1_row = pvec_ref[3:4, :]
    wc2_row = pvec_ref[4:5, :]
    bc2_row = pvec_ref[5:6, :]
    wc1 = pmat_ref[LANE:2 * LANE, :]                                      # [128, 128]

    p = jnp.sum(part_ref[...], axis=0)                                    # [G, 128] f32
    z = jnp.maximum(jnp.dot(p.astype(mdt), wc1, preferred_element_type=f32) + bc1_row, 0.0)
    # final 32->1 projection off the MXU: lane multiply + lane reduce (VPU/XLU)
    logit = jnp.sum(z * wc2_row, axis=-1, keepdims=True)                  # [G, 1]
    out_ref[...] = jax.nn.sigmoid(logit + bc2_row)                        # [G, 128] lane-dense


# ---------------------------------------------------------------------------
# JAX glue: adjacency / pool construction, parameter packing, jitted forward.
# ---------------------------------------------------------------------------
def build_gcn_adjacency(edge_index, num_nodes, dtype=jnp.float32):
    """Dense D^-1/2 (A + I) D^-1/2 (PyG GCNConv gcn_norm), emitted in `dtype`."""
    src, dst = edge_index[0], edge_index[1]
    self_loops = jnp.arange(num_nodes, dtype=src.dtype)
    src = jnp.concatenate([src, self_loops])
    dst = jnp.concatenate([dst, self_loops])
    adj = jnp.zeros((num_nodes, num_nodes), jnp.float32).at[dst, src].add(1.0)
    deg = adj.sum(axis=1)
    dinv = jnp.where(deg > 0, 1.0 / jnp.sqrt(deg), 0.0)
    return (dinv[:, None] * adj * dinv[None, :]).astype(dtype)


def build_mean_poolT(batch, num_nodes, num_graphs):
    """[N, G] matrix s.t. poolT.T @ h == global_mean_pool(h, batch)."""
    one_hot = (batch[:, None] == jnp.arange(num_graphs)[None, :]).astype(jnp.float32)
    counts = jnp.maximum(one_hot.sum(axis=0, keepdims=True), 1.0)
    return one_hot / counts


def init_params(key, hidden_dim, cls_hidden=32):
    ks = jax.random.split(key, 8)
    scale = lambda fan_in: 1.0 / jnp.sqrt(jnp.float32(fan_in))
    w1 = jax.random.normal(ks[0], (1, hidden_dim), jnp.float32) * scale(1)
    b1 = jax.random.normal(ks[1], (1, hidden_dim), jnp.float32) * 0.01
    w2 = jax.random.normal(ks[2], (hidden_dim, hidden_dim), jnp.float32) * scale(hidden_dim)
    b2 = jax.random.normal(ks[3], (1, hidden_dim), jnp.float32) * 0.01
    wc1 = jax.random.normal(ks[4], (hidden_dim, cls_hidden), jnp.float32) * scale(hidden_dim)
    bc1 = jax.random.normal(ks[5], (1, cls_hidden), jnp.float32) * 0.01
    wc2 = jax.random.normal(ks[6], (cls_hidden, 1), jnp.float32) * scale(cls_hidden)
    bc2 = jax.random.normal(ks[7], (1, 1), jnp.float32) * 0.01
    return (w1, b1, w2, b2, wc1, bc1, wc2, bc2)


def pack_params(params, matmul_dtype=jnp.bfloat16):
    """Zero-pad to 128 lanes; f32 vec slab [8,128] + matmul-dtype mat slab [256,128]."""
    (w1, b1, w2, b2, wc1, bc1, wc2, bc2) = params

    def pad_row(v):
        v = jnp.asarray(v, jnp.float32).reshape(1, -1)
        return jnp.pad(v, ((0, 0), (0, LANE - v.shape[1])))

    par_vec = jnp.concatenate([
        pad_row(w1), pad_row(b1), pad_row(b2), pad_row(bc1),
        pad_row(wc2.reshape(-1)),
        jnp.broadcast_to(jnp.asarray(bc2, jnp.float32).reshape(1, 1), (1, LANE)),
        jnp.zeros((2, LANE), jnp.float32),
    ], axis=0)                                                            # [8, 128] f32

    w2p = jnp.pad(jnp.asarray(w2, jnp.float32),
                  ((0, LANE - w2.shape[0]), (0, LANE - w2.shape[1])))
    wc1p = jnp.pad(jnp.asarray(wc1, jnp.float32),
                   ((0, LANE - wc1.shape[0]), (0, LANE - wc1.shape[1])))
    par_mat = jnp.concatenate([w2p, wc1p], axis=0).astype(matmul_dtype)   # [256, 128]
    return par_vec, par_mat


@functools.partial(jax.jit, static_argnames=("num_graphs", "row_tile", "matmul_dtype"))
def gnn_classifier_forward(x, edge_index, batch, par_vec, par_mat, *,
                           num_graphs, row_tile=512, matmul_dtype=jnp.bfloat16):
    """Full forward; returns [G, 1] probabilities (f32)."""
    num_nodes = x.shape[0]
    assert row_tile % 8 == 0
    tm = row_tile if row_tile <= num_nodes else _round_up(num_nodes, 8)
    n_pad = _round_up(num_nodes, tm)
    n_tiles = n_pad // tm
    pad = n_pad - num_nodes

    # Built/cast/padded inside the same jit as the pallas_calls -> no extra
    # eager HBM pass for the bf16 conversion of the O(N^2) adjacency.
    a = jnp.pad(build_gcn_adjacency(edge_index, num_nodes, dtype=matmul_dtype),
                ((0, pad), (0, pad)))                                     # [Np, Np]
    xp = jnp.pad(x.astype(matmul_dtype), ((0, pad), (0, 0)))              # [Np, 1]
    poolT = jnp.pad(build_mean_poolT(batch, num_nodes, num_graphs),
                    ((0, pad), (0, 0)))                                   # [Np, G] f32

    vmem_limit = _vmem_limit_bytes()
    grid_cparams = pltpu.CompilerParams(dimension_semantics=("parallel",),
                                        vmem_limit_bytes=vmem_limit)

    # --- pass 1 over A: hw = ReLU((A x) * w1 + b1) @ W2 -------------------
    hw = pl.pallas_call(
        _layer1_kernel,
        grid=(n_tiles,),
        in_specs=[pl.BlockSpec((n_pad, 1), lambda i: (0, 0)),             # x (resident)
                  pl.BlockSpec((tm, n_pad), lambda i: (i, 0)),            # A row tile (streamed)
                  pl.BlockSpec((VEC_ROWS, LANE), lambda i: (0, 0)),       # f32 vec slab
                  pl.BlockSpec((MAT_ROWS, LANE), lambda i: (0, 0))],      # bf16/f32 mat slab
        out_specs=pl.BlockSpec((tm, LANE), lambda i: (i, 0)),
        out_shape=jax.ShapeDtypeStruct((n_pad, LANE), matmul_dtype),
        compiler_params=grid_cparams,
    )(xp, a, par_vec, par_mat)

    # --- pass 2 over A: h2 tiles + per-tile partial mean-pool -------------
    partials = pl.pallas_call(
        _layer2_pool_kernel,
        grid=(n_tiles,),
        in_specs=[pl.BlockSpec((tm, n_pad), lambda i: (i, 0)),            # A row tile (streamed)
                  pl.BlockSpec((n_pad, LANE), lambda i: (0, 0)),          # hw (resident)
                  pl.BlockSpec((tm, num_graphs), lambda i: (i, 0)),       # poolT row tile
                  pl.BlockSpec((VEC_ROWS, LANE), lambda i: (0, 0))],
        out_specs=pl.BlockSpec((1, num_graphs, LANE), lambda i: (i, 0, 0)),
        out_shape=jax.ShapeDtypeStruct((n_tiles, num_graphs, LANE), jnp.float32),
        compiler_params=grid_cparams,
    )(a, hw, poolT, par_vec)

    # --- head: reduce partials, classifier MLP, sigmoid (tiny) ------------
    out = pl.pallas_call(
        _head_kernel,
        in_specs=[pl.BlockSpec(memory_space=pltpu.MemorySpace.VMEM)] * 3,
        out_specs=pl.BlockSpec(memory_space=pltpu.MemorySpace.VMEM),
        out_shape=jax.ShapeDtypeStruct((num_graphs, LANE), jnp.float32),
        compiler_params=pltpu.CompilerParams(vmem_limit_bytes=vmem_limit),
    )(partials, par_vec, par_mat)

    return out[:, :1]                                                     # [G, 1]


def reference_forward(x, a_hat, poolT, params):
    (w1, b1, w2, b2, wc1, bc1, wc2, bc2) = params
    h = jnp.maximum(a_hat @ (x @ w1) + b1, 0.0)
    h = a_hat @ (h @ w2) + b2
    p = poolT.T @ h
    z = jnp.maximum(p @ wc1 + bc1, 0.0)
    return jax.nn.sigmoid(z @ wc2 + bc2)


if __name__ == "__main__":
    key = jax.random.PRNGKey(0)
    k_x, k_p = jax.random.split(key)

    hidden_dim = 64          # GNNClassifier default
    num_nodes = 16           # two graphs of 8 nodes each
    num_graphs = 2

    # Node features [N, 1]
    x = jax.random.normal(k_x, (num_nodes, 1), jnp.float32)

    # Deterministic edge_index: ring within each graph (both directions).
    src_list, dst_list = [], []
    for g in range(num_graphs):
        off = g * 8
        for i in range(8):
            a, b = off + i, off + (i + 1) % 8
            src_list += [a, b]
            dst_list += [b, a]
    edge_index = jnp.array([src_list, dst_list], dtype=jnp.int32)         # [2, 32]
    batch = jnp.array([0] * 8 + [1] * 8, dtype=jnp.int32)

    params = init_params(k_p, hidden_dim)
    par_vec, par_mat_bf16 = pack_params(params, jnp.bfloat16)
    _, par_mat_f32 = pack_params(params, jnp.float32)

    # Pure-JAX reference
    a_hat_f32 = build_gcn_adjacency(edge_index, num_nodes)
    poolT_f32 = build_mean_poolT(batch, num_nodes, num_graphs)
    ref = reference_forward(x, a_hat_f32, poolT_f32, params)

    # Production path: bf16 streaming A tiles, f32 accumulation/elementwise.
    # row_tile=8 here just to exercise a multi-step pipelined grid at N=16;
    # realistic graphs use the default (>=512 rows per tile).
    out_bf16 = jax.block_until_ready(
        gnn_classifier_forward(x, edge_index, batch, par_vec, par_mat_bf16,
                               num_graphs=num_graphs, row_tile=8,
                               matmul_dtype=jnp.bfloat16))
    # Exactness-check path: pure f32.
    out_f32 = jax.block_until_ready(
        gnn_classifier_forward(x, edge_index, batch, par_vec, par_mat_f32,
                               num_graphs=num_graphs, row_tile=8,
                               matmul_dtype=jnp.float32))

    assert out_bf16.shape == (num_graphs, 1)
    assert out_f32.shape == (num_graphs, 1)
    assert jnp.allclose(out_f32, ref, atol=1e-5, rtol=1e-5), (out_f32, ref)
    assert jnp.allclose(out_bf16, ref, atol=2e-2, rtol=2e-2), (out_bf16, ref)

    print("KERNEL_OK")
</pallas_src>

<mosaic_0001>
module attributes {stable_mosaic.version = 11 : i64} {
  func.func @_layer1_kernel(%arg0: i32, %arg1: memref<16x1xbf16, #tpu.memory_space<vmem>>, %arg2: memref<8x16xbf16, #tpu.memory_space<vmem>>, %arg3: memref<8x128xf32, #tpu.memory_space<vmem>>, %arg4: memref<256x128xbf16, #tpu.memory_space<vmem>>, %arg5: memref<8x128xbf16, #tpu.memory_space<vmem>>) attributes {dimension_semantics = [#tpu.dimension_semantics<parallel>], iteration_bounds = array<i64: 2>, scalar_prefetch = 0 : i64, scratch_operands = 0 : i64, tpu.core_type = #tpu.core_type<tc>, window_params = [{pipeline_mode = #tpu.pipeline_mode<synchronous>, transform_indices = @transform_0, window_bounds = array<i64: 16, 1>}, {transform_indices = @transform_1, window_bounds = array<i64: 8, 16>}, {pipeline_mode = #tpu.pipeline_mode<synchronous>, transform_indices = @transform_2, window_bounds = array<i64: 8, 128>}, {pipeline_mode = #tpu.pipeline_mode<synchronous>, transform_indices = @transform_3, window_bounds = array<i64: 256, 128>}, {transform_indices = @transform_4, window_bounds = array<i64: 8, 128>}]} {
    %c0 = arith.constant 0 : index
    %c0_0 = arith.constant 0 : index
    %0 = vector.load %arg3[%c0, %c0_0] : memref<8x128xf32, #tpu.memory_space<vmem>>, vector<1x128xf32>
    %c1 = arith.constant 1 : index
    %c0_1 = arith.constant 0 : index
    %1 = vector.load %arg3[%c1, %c0_1] : memref<8x128xf32, #tpu.memory_space<vmem>>, vector<1x128xf32>
    %c0_2 = arith.constant 0 : index
    %c0_3 = arith.constant 0 : index
    %2 = vector.load %arg4[%c0_2, %c0_3] : memref<256x128xbf16, #tpu.memory_space<vmem>>, vector<128x128xbf16>
    %c0_4 = arith.constant 0 : index
    %c0_5 = arith.constant 0 : index
    %3 = vector.load %arg2[%c0_4, %c0_5] : memref<8x16xbf16, #tpu.memory_space<vmem>>, vector<8x16xbf16>
    %c0_6 = arith.constant 0 : index
    %c0_7 = arith.constant 0 : index
    %4 = vector.load %arg1[%c0_6, %c0_7] : memref<16x1xbf16, #tpu.memory_space<vmem>>, vector<16x1xbf16>
    %cst = arith.constant dense<0.000000e+00> : vector<8x1xf32>
    %5 = tpu.matmul %3, %4, %cst {dimension_numbers = #tpu.dot_dimension_numbers<[1], [0], [0], [1], [0, 0, 1, 1], [], []>} : vector<8x16xbf16>, vector<16x1xbf16>, vector<8x1xf32> -> vector<8x1xf32>
    %6 = vector.broadcast %5 : vector<8x1xf32> to vector<8x128xf32>
    %7 = vector.broadcast %0 : vector<1x128xf32> to vector<8x128xf32>
    %8 = arith.mulf %6, %7 : vector<8x128xf32>
    %9 = vector.broadcast %1 : vector<1x128xf32> to vector<8x128xf32>
    %10 = arith.addf %8, %9 : vector<8x128xf32>
    %cst_8 = arith.constant 0.000000e+00 : f32
    %11 = vector.broadcast %cst_8 : f32 to vector<8x128xf32>
    %12 = arith.maximumf %10, %11 : vector<8x128xf32>
    %13 = arith.truncf %12 : vector<8x128xf32> to vector<8x128xbf16>
    %cst_9 = arith.constant dense<0.000000e+00> : vector<8x128xf32>
    %14 = tpu.matmul %13, %2, %cst_9 {dimension_numbers = #tpu.dot_dimension_numbers<[1], [0], [0], [1], [0, 0, 1, 1], [], []>} : vector<8x128xbf16>, vector<128x128xbf16>, vector<8x128xf32> -> vector<8x128xf32>
    %15 = arith.truncf %14 : vector<8x128xf32> to vector<8x128xbf16>
    %c0_10 = arith.constant 0 : index
    %c0_11 = arith.constant 0 : index
    %16 = vector.load %arg5[%c0_10, %c0_11] : memref<8x128xbf16, #tpu.memory_space<vmem>>, vector<8x128xbf16>
    tpu.vector_store %arg5[%c0_10, %c0_11], %15 {strides = array<i32>} : memref<8x128xbf16, #tpu.memory_space<vmem>>, vector<8x128xbf16>,
    return
  }
  func.func @transform_0(%arg0: i32) -> (i32, i32) {
    %c0_i32 = arith.constant 0 : i32
    %c0_i32_0 = arith.constant 0 : i32
    %c0_i32_1 = arith.constant 0 : i32
    return %c0_i32, %c0_i32_0 : i32, i32
  }
  func.func @transform_1(%arg0: i32) -> (i32, i32) {
    %c0_i32 = arith.constant 0 : i32
    %c0_i32_0 = arith.constant 0 : i32
    return %arg0, %c0_i32 : i32, i32
  }
  func.func @transform_2(%arg0: i32) -> (i32, i32) {
    %c0_i32 = arith.constant 0 : i32
    %c0_i32_0 = arith.constant 0 : i32
    %c0_i32_1 = arith.constant 0 : i32
    return %c0_i32, %c0_i32_0 : i32, i32
  }
  func.func @transform_3(%arg0: i32) -> (i32, i32) {
    %c0_i32 = arith.constant 0 : i32
    %c0_i32_0 = arith.constant 0 : i32
    %c0_i32_1 = arith.constant 0 : i32
    return %c0_i32, %c0_i32_0 : i32, i32
  }
  func.func @transform_4(%arg0: i32) -> (i32, i32) {
    %c0_i32 = arith.constant 0 : i32
    %c0_i32_0 = arith.constant 0 : i32
    return %arg0, %c0_i32 : i32, i32
  }
}

module attributes {stable_mosaic.version = 11 : i64} {
  func.func @_layer2_pool_kernel(%arg0: i32, %arg1: memref<8x16xbf16, #tpu.memory_space<vmem>>, %arg2: memref<16x128xbf16, #tpu.memory_space<vmem>>, %arg3: memref<8x2xf32, #tpu.memory_space<vmem>>, %arg4: memref<8x128xf32, #tpu.memory_space<vmem>>, %arg5: memref<1x2x128xf32, #tpu.memory_space<vmem>>) attributes {dimension_semantics = [#tpu.dimension_semantics<parallel>], iteration_bounds = array<i64: 2>, scalar_prefetch = 0 : i64, scratch_operands = 0 : i64, tpu.core_type = #tpu.core_type<tc>, window_params = [{transform_indices = @transform_0, window_bounds = array<i64: 8, 16>}, {pipeline_mode = #tpu.pipeline_mode<synchronous>, transform_indices = @transform_1, window_bounds = array<i64: 16, 128>}, {transform_indices = @transform_2, window_bounds = array<i64: 8, 2>}, {pipeline_mode = #tpu.pipeline_mode<synchronous>, transform_indices = @transform_3, window_bounds = array<i64: 8, 128>}, {transform_indices = @transform_4, window_bounds = array<i64: 1, 2, 128>}]} {
    %c2 = arith.constant 2 : index
    %c0 = arith.constant 0 : index
    %0 = vector.load %arg4[%c2, %c0] : memref<8x128xf32, #tpu.memory_space<vmem>>, vector<1x128xf32>
    %c0_0 = arith.constant 0 : index
    %c0_1 = arith.constant 0 : index
    %1 = vector.load %arg1[%c0_0, %c0_1] : memref<8x16xbf16, #tpu.memory_space<vmem>>, vector<8x16xbf16>
    %c0_2 = arith.constant 0 : index
    %c0_3 = arith.constant 0 : index
    %2 = vector.load %arg2[%c0_2, %c0_3] : memref<16x128xbf16, #tpu.memory_space<vmem>>, vector<16x128xbf16>
    %cst = arith.constant dense<0.000000e+00> : vector<8x128xf32>
    %3 = tpu.matmul %1, %2, %cst {dimension_numbers = #tpu.dot_dimension_numbers<[1], [0], [0], [1], [0, 0, 1, 1], [], []>} : vector<8x16xbf16>, vector<16x128xbf16>, vector<8x128xf32> -> vector<8x128xf32>
    %4 = vector.broadcast %0 : vector<1x128xf32> to vector<8x128xf32>
    %5 = arith.addf %3, %4 : vector<8x128xf32>
    %c0_4 = arith.constant 0 : index
    %c0_5 = arith.constant 0 : index
    %6 = vector.load %arg3[%c0_4, %c0_5] : memref<8x2xf32, #tpu.memory_space<vmem>>, vector<8x2xf32>
    %cst_6 = arith.constant dense<0.000000e+00> : vector<2x128xf32>
    %7 = tpu.matmul %6, %5, %cst_6 {dimension_numbers = #tpu.dot_dimension_numbers<[0], [0], [1], [1], [0, 1, 1, 1], [], []>} : vector<8x2xf32>, vector<8x128xf32>, vector<2x128xf32> -> vector<2x128xf32>
    %8 = vector.shape_cast %7 : vector<2x128xf32> to vector<1x2x128xf32>
    %c0_7 = arith.constant 0 : index
    %c0_8 = arith.constant 0 : index
    %c0_9 = arith.constant 0 : index
    %9 = vector.load %arg5[%c0_7, %c0_8, %c0_9] : memref<1x2x128xf32, #tpu.memory_space<vmem>>, vector<1x2x128xf32>
    tpu.vector_store %arg5[%c0_7, %c0_8, %c0_9], %8 {strides = array<i32>} : memref<1x2x128xf32, #tpu.memory_space<vmem>>, vector<1x2x128xf32>,
    return
  }
  func.func @transform_0(%arg0: i32) -> (i32, i32) {
    %c0_i32 = arith.constant 0 : i32
    %c0_i32_0 = arith.constant 0 : i32
    return %arg0, %c0_i32 : i32, i32
  }
  func.func @transform_1(%arg0: i32) -> (i32, i32) {
    %c0_i32 = arith.constant 0 : i32
    %c0_i32_0 = arith.constant 0 : i32
    %c0_i32_1 = arith.constant 0 : i32
    return %c0_i32, %c0_i32_0 : i32, i32
  }
  func.func @transform_2(%arg0: i32) -> (i32, i32) {
    %c0_i32 = arith.constant 0 : i32
    %c0_i32_0 = arith.constant 0 : i32
    return %arg0, %c0_i32 : i32, i32
  }
  func.func @transform_3(%arg0: i32) -> (i32, i32) {
    %c0_i32 = arith.constant 0 : i32
    %c0_i32_0 = arith.constant 0 : i32
    %c0_i32_1 = arith.constant 0 : i32
    return %c0_i32, %c0_i32_0 : i32, i32
  }
  func.func @transform_4(%arg0: i32) -> (i32, i32, i32) {
    %c0_i32 = arith.constant 0 : i32
    %c0_i32_0 = arith.constant 0 : i32
    %c0_i32_1 = arith.constant 0 : i32
    return %arg0, %c0_i32, %c0_i32_0 : i32, i32, i32
  }
}

module attributes {stable_mosaic.version = 11 : i64} {
  func.func @_head_kernel(%arg0: memref<2x2x128xf32, #tpu.memory_space<vmem>>, %arg1: memref<8x128xf32, #tpu.memory_space<vmem>>, %arg2: memref<256x128xbf16, #tpu.memory_space<vmem>>, %arg3: memref<2x128xf32, #tpu.memory_space<vmem>>) attributes {dimension_semantics = [], scalar_prefetch = 0 : i64, scratch_operands = 0 : i64, tpu.core_type = #tpu.core_type<tc>} {
    %c3 = arith.constant 3 : index
    %c0 = arith.constant 0 : index
    %0 = vector.load %arg1[%c3, %c0] : memref<8x128xf32, #tpu.memory_space<vmem>>, vector<1x128xf32>
    %c4 = arith.constant 4 : index
    %c0_0 = arith.constant 0 : index
    %1 = vector.load %arg1[%c4, %c0_0] : memref<8x128xf32, #tpu.memory_space<vmem>>, vector<1x128xf32>
    %c5 = arith.constant 5 : index
    %c0_1 = arith.constant 0 : index
    %2 = vector.load %arg1[%c5, %c0_1] : memref<8x128xf32, #tpu.memory_space<vmem>>, vector<1x128xf32>
    %c128 = arith.constant 128 : index
    %c0_2 = arith.constant 0 : index
    %3 = vector.load %arg2[%c128, %c0_2] : memref<256x128xbf16, #tpu.memory_space<vmem>>, vector<128x128xbf16>
    %c0_3 = arith.constant 0 : index
    %c0_4 = arith.constant 0 : index
    %c0_5 = arith.constant 0 : index
    %4 = vector.load %arg0[%c0_3, %c0_4, %c0_5] : memref<2x2x128xf32, #tpu.memory_space<vmem>>, vector<2x2x128xf32>
    %cst = arith.constant dense<0.000000e+00> : vector<2x128xf32>
    %5 = vector.multi_reduction <add>, %4, %cst [0] : vector<2x2x128xf32> to vector<2x128xf32>
    %6 = arith.truncf %5 : vector<2x128xf32> to vector<2x128xbf16>
    %cst_6 = arith.constant dense<0.000000e+00> : vector<2x128xf32>
    %7 = tpu.matmul %6, %3, %cst_6 {dimension_numbers = #tpu.dot_dimension_numbers<[1], [0], [0], [1], [0, 0, 1, 1], [], []>} : vector<2x128xbf16>, vector<128x128xbf16>, vector<2x128xf32> -> vector<2x128xf32>
    %8 = vector.broadcast %0 : vector<1x128xf32> to vector<2x128xf32>
    %9 = arith.addf %7, %8 : vector<2x128xf32>
    %cst_7 = arith.constant 0.000000e+00 : f32
    %10 = vector.broadcast %cst_7 : f32 to vector<2x128xf32>
    %11 = arith.maximumf %9, %10 : vector<2x128xf32>
    %12 = vector.broadcast %1 : vector<1x128xf32> to vector<2x128xf32>
    %13 = arith.mulf %11, %12 : vector<2x128xf32>
    %cst_8 = arith.constant dense<0.000000e+00> : vector<2xf32>
    %14 = vector.multi_reduction <add>, %13, %cst_8 [1] : vector<2x128xf32> to vector<2xf32>
    %15 = vector.shape_cast %14 : vector<2xf32> to vector<2x1xf32>
    %16 = vector.broadcast %15 : vector<2x1xf32> to vector<2x128xf32>
    %17 = vector.broadcast %2 : vector<1x128xf32> to vector<2x128xf32>
    %18 = arith.addf %16, %17 : vector<2x128xf32>
    %19 = arith.negf %18 : vector<2x128xf32>
    %20 = math.exp %19 : vector<2x128xf32>
    %cst_9 = arith.constant 1.000000e+00 : f32
    %21 = vector.broadcast %cst_9 : f32 to vector<2x128xf32>
    %22 = arith.addf %21, %20 : vector<2x128xf32>
    %23 = arith.divf %21, %22 : vector<2x128xf32>
    %c0_10 = arith.constant 0 : index
    %c0_11 = arith.constant 0 : index
    %24 = vector.load %arg3[%c0_10, %c0_11] : memref<2x128xf32, #tpu.memory_space<vmem>>, vector<2x128xf32>
    tpu.vector_store %arg3[%c0_10, %c0_11], %23 {strides = array<i32>} : memref<2x128xf32, #tpu.memory_space<vmem>>, vector<2x128xf32>,
    return
  }
}

</mosaic_0001>

<bundles_post_ra>
// kernel: gnn_classifier_forward.3
= control target key start
LH: loop header
LB: loop body
LE: loop exit
PB: predicated region body
PF: predicated region fallthrough
CT: control target
= control target key end

     0   :  { %s466_s15 = smov 0   ;;  %s523_s0 = inlined_call_operand.vmem [shape: bf16[16,1], index: 0, kind: input, shape index: {}]   ;;  %s524_s1 = inlined_call_operand.vmem [shape: bf16[16,16], index: 1, kind: input, shape index: {}]   ;;  %s525_s2 = inlined_call_operand.vmem [shape: f32[8,128], index: 2, kind: input, shape index: {}]   ;;  %s526_s3 = inlined_call_operand.vmem [shape: bf16[256,128], index: 3, kind: input, shape index: {}]   ;;  %s527_s4 = inlined_call_operand.vmem [shape: bf16[16,128], index: 4, kind: output, shape index: {}]  }
   0x1 LB: > { %s365_s16 = sadd.s32 4294967295, %s438_s15   ;;  %p369_p0 = scmp.ge.s32.totalorder %s438_s15, 1  ;;  %s438_s15 = sphi %s466_s15, %s14_s15  }
   0x2   : > { %p161_p1 = scmp.lt.s32.totalorder %s438_s15, 3 }
   0x4   : > { %p162_p2 = pnand %p369_p0, %p161_p1 }
   0x5   : > { %p185_p3 = scmp.lt.s32.totalorder (!%p162_p2), %s365_s16, 1 }
   0x6   : > { %165 = sbr.rel (%p162_p2) target bundleno = 398 (0x18e), region = 36 }
   0xb   : > { %v419_v0 = vld [vmem:[%s523_s0] sm:$0xff]  ;;  %v440_v1 = vmov 0   ;;  %s529_s16 = smov (!%p185_p3, %s365_s16), 1  ;;  %vm221_vm0 = vcmask 130048   ;;  %v418_v3 = vld [vmem:[%s526_s3 + $0x38] sm:$0xff]  ;;  %v417_v4 = vld [vmem:[%s526_s3 + $0x30] sm:$0xff] }
   0xc   : > { %429 = vset.pattern.permute.xlu0 %v440_v1  ;;  %232 = vmatpush.bf16.msra.mxu0 %v419_v0  ;;  %s370_s19 = sshll.u32 %s529_s16, 2  ;;  %v416_v5 = vld [vmem:[%s526_s3 + $0x28] sm:$0xff]  ;;  %v415_v6 = vld [vmem:[%s526_s3 + $0x20] sm:$0xff]  ;;  %v414_v7 = vld [vmem:[%s526_s3 + $0x18] sm:$0xff] }
   0xd   : > { %s188_s22 = scalar_lea.vmem %s524_s1, %s370_s19  ;;  %297 = vmatpush.bf16.msra.mxu1 %v418_v3  ;;  %v413_v8 = vld [vmem:[%s526_s3 + $0x10] sm:$0xff]  ;;  %v412_v11 = vld [vmem:[%s526_s3 + $0x8] sm:$0xff]  ;;  %v411_v12 = vld [vmem:[%s526_s3] sm:$0xff] }
   0xe   : > { %v212_v2 = vld [vmem:[%s188_s22] sm:$0xf]  ;;  %s192_s22 = scalar_lea.vmem %s527_s4, %s370_s19 }
   0xf   : > { %376 = vmatmul.msk.bf16.vlgmr.msra.gmra.mxu0 %vm221_vm0, %v212_v2  ;;  %v430_v13 = vld [vmem:[%s525_s2] ss:$0 sm:$0xff]  ;;  %v431_v14 = vld [vmem:[%s525_s2 + $0x1] ss:$0 sm:$0xff] }
  0x11   : > { %298 = vmatpush.bf16.msra.mxu1 %v417_v4 }
  0x15   : > { %299 = vmatpush.bf16.msra.mxu1 %v416_v5 }
  0x19   : > { %300 = vmatpush.bf16.msra.mxu1 %v415_v6 }
  0x1d   : > { %301 = vmatpush.bf16.msra.mxu1 %v414_v7 }
  0x21   : > { %302 = vmatpush.bf16.msra.mxu1 %v413_v8 }
  0x25   : > { %303 = vmatpush.bf16.msra.mxu1 %v412_v11 }
  0x29   : > { %304 = vmatpush.bf16.msra.mxu1 %v411_v12 }
  0x8c   : > { %v234_v9 = vpop.f32.mrf.mxu0 }
  0x8d   : > { %240 = vperm.xlu0 %429, %v234_v9  }
  0x94   : > { %v236_v10 = vpop.f32.mrf.mxu0 }
  0xff   : > { %v241_v15 = vpop.permute.xlu0 %240 }
 0x100   : > { %v244_v16 = vmul.f32 %v430_v13, %v241_v15 }
 0x102   : > { %v246_v17 = vadd.f32 %v431_v14, %v244_v16 }
 0x104   : > { %v247_v18 = vmax.f32 %v246_v17, 0.0 }
 0x106   : > { %v248_v19 = vpack.c.bf16 %v247_v18, %v247_v18 }
 0x108   : > { %305 = vmatmul.bf16.vlgmr.msra.gmra.mxu1 %v248_v19 }
 0x185   : > { %v306_v20 = vpop.f32.mrf.mxu1 }
 0x186   : > { %v310_v21 = vpack.c.bf16 %v306_v20, %v306_v20 }
 0x188   : > { %311 = vst [vmem:[%s192_s22] sm:$0xf] %v310_v21 }
 0x18d   : > { %v308_v22 = vpop.f32.mrf.mxu1 }
 0x18e PF: > { %s14_s15 = sadd.s32 1, %s438_s15  }
 0x18f   : > { %p11_p4 = scmp.ge.s32.totalorder %s14_s15, 4  }
 0x191   :  { %13 = sbr.rel (!%p11_p4) target bundleno = 1 (0x1), region = 66 }

// kernel: gnn_classifier_forward.5
= control target key start
LH: loop header
LB: loop body
LE: loop exit
PB: predicated region body
PF: predicated region fallthrough
CT: control target
= control target key end

     0   :  { %vm35_vm0 = vcmask 1041408   ;;  %s247_s2 = inlined_call_operand.vmem [shape: bf16[256,128], index: 2, kind: input, shape index: {}]   ;;  %s248_s1 = inlined_call_operand.vmem [shape: f32[8,128], index: 1, kind: input, shape index: {}]   ;;  %s249_s0 = inlined_call_operand.vmem [shape: f32[2,2,128], index: 0, kind: input, shape index: {}]   ;;  %s250_s3 = inlined_call_operand.vmem [shape: f32[2,128], index: 3, kind: output, shape index: {}]  }
   0x1   :  { %v174_v0 = vld [vmem:[%s247_s2 + $0x78] sm:$0xff]  ;;  %v173_v1 = vld [vmem:[%s247_s2 + $0x70] sm:$0xff]  ;;  %v172_v2 = vld [vmem:[%s247_s2 + $0x68] sm:$0xff] }
   0x2   :  { %89 = vmatpush.bf16.msra.mxu0 %v174_v0  ;;  %v171_v3 = vld [vmem:[%s247_s2 + $0x60] sm:$0xff]  ;;  %v170_v4 = vld [vmem:[%s247_s2 + $0x58] sm:$0xff]  ;;  %v169_v5 = vld [vmem:[%s247_s2 + $0x50] sm:$0xff] }
   0x3   :  { %v33_v6 = vld [vmem:[%s249_s0] sm:$0x3]  ;;  %v34_v7 = vld [vmem:[%s249_s0 + $0x2] sm:$0x3]  ;;  %v168_v8 = vld [vmem:[%s247_s2 + $0x48] sm:$0xff] }
   0x4   :  { %v36_v9 = vsel %vm35_vm0, %v33_v6, 0.0  ;;  %v37_v10 = vsel %vm35_vm0, %v34_v7, 0.0  ;;  %v167_v12 = vld [vmem:[%s247_s2 + $0x40] sm:$0xff] }
   0x5   :  { %v38_v11 = vadd.f32 %v37_v10, %v36_v9  ;;  %v175_v14 = vld [vmem:[%s248_s1 + $0x3] ss:$0 sm:$0xff]  ;;  %v176_v17 = vld [vmem:[%s248_s1 + $0x4] ss:$0 sm:$0xff]  ;;  %v177_v22 = vld [vmem:[%s248_s1 + $0x5] ss:$0 sm:$0xff] }
   0x6   :  { %90 = vmatpush.bf16.msra.mxu0 %v173_v1 }
   0x7   :  { %v39_v13 = vpack.c.bf16 %v38_v11, %v38_v11 }
   0xa   :  { %91 = vmatpush.bf16.msra.mxu0 %v172_v2 }
   0xe   :  { %92 = vmatpush.bf16.msra.mxu0 %v171_v3 }
  0x12   :  { %93 = vmatpush.bf16.msra.mxu0 %v170_v4 }
  0x16   :  { %94 = vmatpush.bf16.msra.mxu0 %v169_v5 }
  0x1a   :  { %95 = vmatpush.bf16.msra.mxu0 %v168_v8 }
  0x1e   :  { %96 = vmatpush.bf16.msra.mxu0 %v167_v12 }
  0x21   :  { %97 = vmatmul.bf16.vlgmr.msra.gmra.mxu0 %v39_v13 }
  0x9e   :  { %v98_v15 = vpop.f32.mrf.mxu0 }
  0x9f   :  { %v99_v16 = vadd.f32 %v175_v14, %v98_v15 }
  0xa1   :  { %v102_v18 = vmax.f32 %v99_v16, 0.0 }
  0xa3   :  { %v104_v19 = vmul.f32 %v176_v17, %v102_v18 }
  0xa5   :  { %v105_v20 = vsel %vm35_vm0, %v104_v19, 0.0 }
  0xa6   :  { %v100_v21 = vpop.f32.mrf.mxu0  ;;  %106 = vadd.xlane.f32.xlu0 %v105_v20 }
 0x119   :  { %v107_v23 = vpop.xlane.xlu0 %106 }
 0x11a   :  { %v109_v24 = vadd.f32 %v177_v22, %v107_v23 }
 0x11c   :  { %v166_v25 = vmul.f32 -1.442695, %v109_v24 }
 0x11e   :  { %178 = vpow2.f32 %v166_v25 }
 0x124   :  { %v179_v26 = vpop.eup %178 }
 0x125   :  { %v113_v27 = vadd.f32 1.0, %v179_v26 }
 0x127   :  { %180 = vrcp.f32 %v113_v27  ;;  %v125_v31 = vand.u32 2147483648, %v113_v27  ;;  %v123_v33 = vand.u32 2147483647, %v113_v27  ;;  %vm119_vm2 = vweird.f32 %v113_v27 }
 0x129   :  { %v126_v35 = vor.u32 1.1754944e-38, %v125_v31  ;;  %vm124_vm4 = vcmp.eq.f32.partialorder %v123_v33, 8.507059e+37 }
 0x12d   :  { %v181_v28 = vpop.eup %180 }
 0x12e   :  { %v115_v29 = vmul.f32 %v181_v28, %v113_v27  ;;  %vm120_vm1 = vweird.f32 %v181_v28 }
 0x12f   :  { %vm121_vm3 = vmor %vm119_vm2, %vm120_vm1 }
 0x130   :  { %v116_v30 = vsub.f32 1.0, %v115_v29 }
 0x132   :  { %v117_v32 = vmul.f32 %v181_v28, %v116_v30 }
 0x134   :  { %v118_v34 = vadd.f32 %v181_v28, %v117_v32 }
 0x136   :  { %v122_v36 = vsel %vm121_vm3, %v181_v28, %v118_v34 }
 0x137   :  { %v127_v37 = vsel %vm124_vm4, %v126_v35, %v122_v36 }
 0x138   :  { %129 = vst [vmem:[%s250_s3] sm:$0x3] %v127_v37 }

// kernel: gnn_classifier_forward.4
= control target key start
LH: loop header
LB: loop body
LE: loop exit
PB: predicated region body
PF: predicated region fallthrough
CT: control target
= control target key end

     0   :  { %s422_s15 = smov 0   ;;  %s448_s0 = inlined_call_operand.vmem [shape: bf16[16,16], index: 0, kind: input, shape index: {}]   ;;  %s449_s1 = inlined_call_operand.vmem [shape: bf16[16,128], index: 1, kind: input, shape index: {}]   ;;  %s450_s2 = inlined_call_operand.vmem [shape: f32[16,2], index: 2, kind: input, shape index: {}]   ;;  %s451_s3 = inlined_call_operand.vmem [shape: f32[8,128], index: 3, kind: input, shape index: {}]   ;;  %s452_s4 = inlined_call_operand.vmem [shape: f32[2,2,128], index: 4, kind: output, shape index: {}]  }
   0x1 LB: > { %s362_s16 = sadd.s32 4294967295, %s395_s15   ;;  %p366_p0 = scmp.ge.s32.totalorder %s395_s15, 1  ;;  %s395_s15 = sphi %s422_s15, %s14_s15  }
   0x2   : > { %p170_p1 = scmp.lt.s32.totalorder %s395_s15, 3 }
   0x4   : > { %p171_p2 = pnand %p366_p0, %p170_p1 }
   0x5   : > { %p198_p3 = scmp.lt.s32.totalorder (!%p171_p2), %s362_s16, 1 }
   0x6   : > { %174 = sbr.rel (%p171_p2) target bundleno = 307 (0x133), region = 36 }
   0xb   : > { %v378_v0 = vld [vmem:[%s449_s1] sm:$0xff]  ;;  %s454_s16 = smov (!%p198_p3, %s362_s16), 1  ;;  %vm222_vm0 = vcmask 130048   ;;  %vm272_vm1 = vcmask 64512  }
   0xc   : > { %233 = vmatpush.bf16.msra.mxu0 %v378_v0  ;;  %s368_s19 = sshll.u32 %s454_s16, 3  ;;  %s367_s20 = sshll.u32 %s454_s16, 2  ;;  %v388_v4 = vld [vmem:[%s451_s3 + $0x2] ss:$0 sm:$0xff] }
   0xd   : > { %s205_s23 = scalar_lea.vmem %s450_s2, %s368_s19  ;;  %s201_s26 = scalar_lea.vmem %s448_s0, %s367_s20 }
   0xe   : > { %v239_v1 = vld [vmem:[%s205_s23] sm:$0xff]  ;;  %s369_s29 = sshll.u32 %s454_s16, 1 }
   0xf   : > { %v212_v2 = vld [vmem:[%s201_s26] sm:$0xf]  ;;  %240 = vxpose.xlu0.b32.start.end [1/1] (short) (narrow) %v239_v1, 8  ;;  %s209_s6 = scalar_lea.vmem %s452_s4, %s369_s29 }
  0x10   : > { %374 = vmatmul.msk.bf16.vlgmr.msra.gmra.mxu0 %vm222_vm0, %v212_v2 }
  0x8d   : > { %v235_v3 = vpop.f32.mrf.mxu0 }
  0x8e   : > { %v236_v5 = vadd.f32 %v388_v4, %v235_v3 }
  0x90   : > { %291 = vmatpush.msra.mxu1 %v236_v5 }
  0x95   : > { %v237_v6 = vpop.f32.mrf.mxu0 }
  0xb3   : > { %v256_v7 = vpop.trf.xlu0 }
  0xb4   : > { %375 = vmatmul.msk.f32.vlgmr.msra.gmra.mxu1 %vm272_vm1, %v256_v7 }
 0x131   : > { %v293_v8 = vpop.f32.mrf.mxu1 }
 0x132   : > { %296 = vst [vmem:[%s209_s6] sm:$0x3] %v293_v8 }
 0x133 PF: > { %s14_s15 = sadd.s32 1, %s395_s15  }
 0x134   : > { %p11_p4 = scmp.ge.s32.totalorder %s14_s15, 4  }
 0x136   :  { %13 = sbr.rel (!%p11_p4) target bundleno = 1 (0x1), region = 69 }

</bundles_post_ra>
